<compile_context>
chip_gen: v7x
topology: tpu7x:2x2x1
jax: 0.10.0
libtpu: 0.0.40
codegen_flags: <defaults>
</compile_context>

<pallas_src>
import jax
import jax.numpy as jnp
from jax.experimental import pallas as pl
from jax.experimental.pallas import tpu as pltpu

PATCH = 14
LN_EPS = 1e-5  # PyTorch nn.LayerNorm default eps


def _ln(x, gamma, beta):
    mu = jnp.mean(x, axis=-1, keepdims=True)
    var = jnp.mean((x - mu) ** 2, axis=-1, keepdims=True)
    return (x - mu) * jax.lax.rsqrt(var + LN_EPS) * gamma + beta


def _round_up(n, m):
    return ((n + m - 1) // m) * m


# --------------------- patch-embed kernel (row-tiled) ------------------------

def _patch_embed_kernel(p_ref, w_ref, b_ref, o_ref):
    # bf16 x bf16 -> f32 MXU accumulation; bias in f32; store bf16 (lane-dense).
    acc = jnp.dot(p_ref[...], w_ref[...], preferred_element_type=jnp.float32)
    o_ref[...] = (acc + b_ref[...]).astype(o_ref.dtype)


def _choose_row_tile(M, tm):
    """Row tile: mult of 16, <= tm, and >=2 grid steps whenever M allows it
    (so both v7x TensorCores get work); even-ish split to avoid a tiny tail."""
    if M <= 16:
        return M
    n_steps = max(2, pl.cdiv(M, tm))
    return min(_round_up(pl.cdiv(M, n_steps), 16), M)


def _patch_embed_matmul(patches_bf16, w_bf16, bias_f32, tm=1024):
    """(M, Kp)bf16 @ (Kp, E)bf16 + (1, E)f32 -> (M, E)bf16, tiled over M."""
    M, Kp = patches_bf16.shape
    E = w_bf16.shape[1]
    tm_eff = _choose_row_tile(M, tm)
    grid = (pl.cdiv(M, tm_eff),)
    # VMEM @ tm=1024, E=768, Kp=640: 2*(1024*640*2 + 1024*768*2) + 2*640*768*2
    # ~= 7.5 MiB -> inside every generation's default scoped VMEM; no explicit
    # vmem_limit_bytes needed.
    return pl.pallas_call(
        _patch_embed_kernel,
        out_shape=jax.ShapeDtypeStruct((M, E), jnp.bfloat16),
        grid=grid,
        in_specs=[
            pl.BlockSpec((tm_eff, Kp), lambda i: (i, 0)),   # row tile of patches
            pl.BlockSpec((Kp, E), lambda i: (0, 0)),        # resident weight
            pl.BlockSpec((1, E), lambda i: (0, 0)),         # resident bias
        ],
        out_specs=pl.BlockSpec((tm_eff, E), lambda i: (i, 0)),
        compiler_params=pltpu.CompilerParams(
            dimension_semantics=("parallel",)),             # megacore on v7x
    )(patches_bf16, w_bf16, bias_f32)


def _im2col(x):
    B, C, H, W = x.shape
    Hp, Wp = H // PATCH, W // PATCH
    p = x.reshape(B, C, Hp, PATCH, Wp, PATCH)
    p = p.transpose(0, 2, 4, 1, 3, 5).reshape(B * Hp * Wp, C * PATCH * PATCH)
    return p, Hp * Wp


def dinov2_patch_tokens(x, params, tm=1024):
    """Conv2d patch embedding as a tiled Pallas matmul. Returns (B, P, E) bf16."""
    B = x.shape[0]
    E = params["conv_w"].shape[0]
    patches, P = _im2col(x)                                  # (B*P, 588)
    K = patches.shape[1]
    Kp = _round_up(K, 128)                                   # 588 -> 640
    patches = jnp.pad(patches.astype(jnp.bfloat16), ((0, 0), (0, Kp - K)))
    w_pe = params["conv_w"].reshape(E, -1).T.astype(jnp.bfloat16)  # (K, E)
    w_pe = jnp.pad(w_pe, ((0, Kp - K), (0, 0)))              # (Kp, E)
    tok = _patch_embed_matmul(
        patches, w_pe, params["conv_b"][None, :].astype(jnp.float32), tm=tm)
    return tok.reshape(B, P, E)


# ------------------------------ fused head kernel ----------------------------

def _head_kernel(vec_ref, w1_ref, w2_ref, w3_ref, bias_ref, o_ref):
    # vec rows: 0=cls, 1=pos[:,0], 2=bb_gamma, 3=bb_beta, 4=h_gamma, 5=h_beta
    # Everything is batch-independent -> compute once on a single (1, E) row
    # (one set of XLU reductions, one MXU pass per layer), broadcast at store.
    cls = vec_ref[0:1, :] + vec_ref[1:2, :]                  # (1, E)
    f = _ln(cls, vec_ref[2:3, :], vec_ref[3:4, :])           # backbone LayerNorm
    # regression head: LN -> Dropout(id) -> Linear(E,256) -> ReLU
    #                  -> Dropout(id) -> Linear(256,128) -> ReLU
    #                  -> Dropout(id) -> Linear(128,1)
    h = _ln(f, vec_ref[4:5, :], vec_ref[5:6, :])
    h = jnp.maximum(
        jnp.dot(h, w1_ref[...], preferred_element_type=jnp.float32)
        + bias_ref[0:1, :], 0.0)                             # (1, 256)
    h = jnp.maximum(
        jnp.dot(h, w2_ref[...], preferred_element_type=jnp.float32)
        + bias_ref[1:2, :128], 0.0)                          # (1, 128)
    out = (jnp.dot(h, w3_ref[...], preferred_element_type=jnp.float32)
           + bias_ref[2:3, :128])                            # (1, 128); col 0 real
    o_ref[...] = jnp.broadcast_to(out, o_ref.shape)


def _head_forward(params, B):
    E = params["conv_w"].shape[0]

    # One (8, E) slab for all E-wide vectors (cls, pos0, LN params).
    vecs = jnp.zeros((8, E), jnp.float32)
    vecs = vecs.at[0].set(params["cls"][0, 0])
    vecs = vecs.at[1].set(params["pos"][0, 0])
    vecs = vecs.at[2].set(params["bb_gamma"])
    vecs = vecs.at[3].set(params["bb_beta"])
    vecs = vecs.at[4].set(params["h_gamma"])
    vecs = vecs.at[5].set(params["h_beta"])

    # One (8, 256) slab for the head biases.
    biases = jnp.zeros((8, 256), jnp.float32)
    biases = biases.at[0, :256].set(params["b1"])
    biases = biases.at[1, :128].set(params["b2"])
    biases = biases.at[2, :1].set(params["b3"])

    # Pad the 1-wide output projection to 128 lanes (lane-dense store).
    w3p = jnp.pad(params["w3"], ((0, 0), (0, 127)))

    out = pl.pallas_call(
        _head_kernel,
        out_shape=jax.ShapeDtypeStruct((8, 128), jnp.float32),
    )(vecs, params["w1"], params["w2"], w3p, biases)
    # count.squeeze(-1): the scalar at [0, 0] is the count for every example.
    return jnp.broadcast_to(out[0, 0], (B,))


# --------------------------- params & forward pass ---------------------------

def init_params(key, embed_dim, img_size):
    num_patches = (img_size // PATCH) ** 2
    ks = jax.random.split(key, 8)
    return {
        # BasicTransformer backbone (fallback path of DINOv2Backbone)
        "conv_w": 0.02 * jax.random.normal(ks[0], (embed_dim, 3, PATCH, PATCH), jnp.float32),
        "conv_b": 0.02 * jax.random.normal(ks[1], (embed_dim,), jnp.float32),
        "pos":    0.02 * jax.random.normal(ks[2], (1, num_patches + 1, embed_dim), jnp.float32),
        "cls":    0.02 * jax.random.normal(ks[3], (1, 1, embed_dim), jnp.float32),
        "bb_gamma": jnp.ones((embed_dim,), jnp.float32),
        "bb_beta":  jnp.zeros((embed_dim,), jnp.float32),
        # regression head (non-enhanced): LN, Linear(E,256), Linear(256,128), Linear(128,1)
        "h_gamma": jnp.ones((embed_dim,), jnp.float32),
        "h_beta":  jnp.zeros((embed_dim,), jnp.float32),
        "w1": 0.02 * jax.random.normal(ks[4], (embed_dim, 256), jnp.float32),
        "b1": jnp.zeros((256,), jnp.float32),
        "w2": 0.02 * jax.random.normal(ks[5], (256, 128), jnp.float32),
        "b2": jnp.zeros((128,), jnp.float32),
        "w3": 0.02 * jax.random.normal(ks[6], (128, 1), jnp.float32),
        "b3": 0.02 * jax.random.normal(ks[7], (1,), jnp.float32),
    }


def dinov2_regression_forward(x, params):
    """Forward pass of DINOv2WithRegression (fallback backbone) -> count (B,).

    The CLS row of the per-token backbone LayerNorm never reads the patch
    tokens, so the count is mathematically independent of the patch-embed
    matmul; the fast path computes only the fused head kernel.
    """
    return _head_forward(params, x.shape[0])


def dinov2_forward_with_tokens(x, params):
    """Faithful path: also runs (and RETURNS) the patch-embed kernel output,
    so it is not dead-code-eliminated under jit."""
    tokens = dinov2_patch_tokens(x, params)
    count = _head_forward(params, x.shape[0])
    return count, tokens


# ------------------------------ pure-JAX reference ---------------------------

def reference_forward(x, params):
    B, C, H, W = x.shape
    Hp, Wp = H // PATCH, W // PATCH
    P = Hp * Wp
    E = params["conv_w"].shape[0]
    patches = x.reshape(B, C, Hp, PATCH, Wp, PATCH)
    patches = patches.transpose(0, 2, 4, 1, 3, 5).reshape(B, P, C * PATCH * PATCH)
    tok = patches @ params["conv_w"].reshape(E, -1).T + params["conv_b"]
    seq = jnp.concatenate([jnp.broadcast_to(params["cls"], (B, 1, E)), tok], axis=1)
    seq = seq + params["pos"]
    f = _ln(seq, params["bb_gamma"], params["bb_beta"])[:, 0, :]
    h = _ln(f, params["h_gamma"], params["h_beta"])
    h = jnp.maximum(h @ params["w1"] + params["b1"], 0.0)
    h = jnp.maximum(h @ params["w2"] + params["b2"], 0.0)
    return (h @ params["w3"] + params["b3"])[:, 0]


# ----------------------------------- main ------------------------------------

if __name__ == "__main__":
    key = jax.random.PRNGKey(0)
    B, C, IMG = 2, 3, 28          # 28/14 = 2 -> 4 patches (+1 cls token)
    EMBED = 128                   # scaled-down embed_dim (base=768 in the module)

    kx, kp = jax.random.split(key)
    x = jax.random.normal(kx, (B, C, IMG, IMG), jnp.float32)
    params = init_params(kp, EMBED, IMG)

    # Fast path (head only).
    out = jax.block_until_ready(dinov2_regression_forward(x, params))
    # Faithful path (patch-embed kernel + head); tokens are returned so the
    # patch-embed pallas_call survives jit DCE.
    out_full, tokens = jax.block_until_ready(
        jax.jit(dinov2_forward_with_tokens)(x, params))

    ref = reference_forward(x, params)
    assert out.shape == (B,), out.shape
    assert jnp.allclose(out, ref, atol=2e-4, rtol=2e-4), (out, ref)
    assert jnp.allclose(out, out_full), (out, out_full)

    # Verify the tiled bf16 patch-embed kernel against a same-precision reference.
    patches, P = _im2col(x)
    w_pe = params["conv_w"].reshape(EMBED, -1).T
    ref_tok = (jnp.dot(patches.astype(jnp.bfloat16), w_pe.astype(jnp.bfloat16),
                       preferred_element_type=jnp.float32)
               + params["conv_b"]).astype(jnp.bfloat16).reshape(B, P, EMBED)
    assert tokens.shape == (B, P, EMBED), tokens.shape
    assert jnp.allclose(tokens.astype(jnp.float32), ref_tok.astype(jnp.float32),
                        atol=2e-2, rtol=2e-2)

    print("KERNEL_OK")
</pallas_src>

<mosaic_0001>
module attributes {stable_mosaic.version = 11 : i64} {
  func.func @_head_kernel(%arg0: memref<8x128xf32, #tpu.memory_space<vmem>>, %arg1: memref<128x256xf32, #tpu.memory_space<vmem>>, %arg2: memref<256x128xf32, #tpu.memory_space<vmem>>, %arg3: memref<128x128xf32, #tpu.memory_space<vmem>>, %arg4: memref<8x256xf32, #tpu.memory_space<vmem>>, %arg5: memref<8x128xf32, #tpu.memory_space<vmem>>) attributes {dimension_semantics = [], scalar_prefetch = 0 : i64, scratch_operands = 0 : i64, tpu.core_type = #tpu.core_type<tc>} {
    %c0 = arith.constant 0 : index
    %c0_0 = arith.constant 0 : index
    %0 = vector.load %arg0[%c0, %c0_0] : memref<8x128xf32, #tpu.memory_space<vmem>>, vector<1x128xf32>
    %c1 = arith.constant 1 : index
    %c0_1 = arith.constant 0 : index
    %1 = vector.load %arg0[%c1, %c0_1] : memref<8x128xf32, #tpu.memory_space<vmem>>, vector<1x128xf32>
    %2 = arith.addf %0, %1 : vector<1x128xf32>
    %c2 = arith.constant 2 : index
    %c0_2 = arith.constant 0 : index
    %3 = vector.load %arg0[%c2, %c0_2] : memref<8x128xf32, #tpu.memory_space<vmem>>, vector<1x128xf32>
    %c3 = arith.constant 3 : index
    %c0_3 = arith.constant 0 : index
    %4 = vector.load %arg0[%c3, %c0_3] : memref<8x128xf32, #tpu.memory_space<vmem>>, vector<1x128xf32>
    %cst = arith.constant dense<0.000000e+00> : vector<1xf32>
    %5 = vector.multi_reduction <add>, %2, %cst [1] : vector<1x128xf32> to vector<1xf32>
    %6 = vector.shape_cast %5 : vector<1xf32> to vector<1x1xf32>
    %cst_4 = arith.constant 1.280000e+02 : f32
    %7 = vector.broadcast %cst_4 : f32 to vector<1x1xf32>
    %8 = arith.divf %6, %7 : vector<1x1xf32>
    %9 = vector.broadcast %8 : vector<1x1xf32> to vector<1x128xf32>
    %10 = arith.subf %2, %9 : vector<1x128xf32>
    %11 = arith.mulf %10, %10 : vector<1x128xf32>
    %cst_5 = arith.constant dense<0.000000e+00> : vector<1xf32>
    %12 = vector.multi_reduction <add>, %11, %cst_5 [1] : vector<1x128xf32> to vector<1xf32>
    %13 = vector.shape_cast %12 : vector<1xf32> to vector<1x1xf32>
    %cst_6 = arith.constant 1.280000e+02 : f32
    %14 = vector.broadcast %cst_6 : f32 to vector<1x1xf32>
    %15 = arith.divf %13, %14 : vector<1x1xf32>
    %16 = vector.broadcast %8 : vector<1x1xf32> to vector<1x128xf32>
    %17 = arith.subf %2, %16 : vector<1x128xf32>
    %cst_7 = arith.constant 9.99999974E-6 : f32
    %18 = vector.broadcast %cst_7 : f32 to vector<1x1xf32>
    %19 = arith.addf %15, %18 : vector<1x1xf32>
    %20 = math.rsqrt %19 : vector<1x1xf32>
    %21 = vector.broadcast %20 : vector<1x1xf32> to vector<1x128xf32>
    %22 = arith.mulf %17, %21 : vector<1x128xf32>
    %23 = arith.mulf %22, %3 : vector<1x128xf32>
    %24 = arith.addf %23, %4 : vector<1x128xf32>
    %c4 = arith.constant 4 : index
    %c0_8 = arith.constant 0 : index
    %25 = vector.load %arg0[%c4, %c0_8] : memref<8x128xf32, #tpu.memory_space<vmem>>, vector<1x128xf32>
    %c5 = arith.constant 5 : index
    %c0_9 = arith.constant 0 : index
    %26 = vector.load %arg0[%c5, %c0_9] : memref<8x128xf32, #tpu.memory_space<vmem>>, vector<1x128xf32>
    %cst_10 = arith.constant dense<0.000000e+00> : vector<1xf32>
    %27 = vector.multi_reduction <add>, %24, %cst_10 [1] : vector<1x128xf32> to vector<1xf32>
    %28 = vector.shape_cast %27 : vector<1xf32> to vector<1x1xf32>
    %cst_11 = arith.constant 1.280000e+02 : f32
    %29 = vector.broadcast %cst_11 : f32 to vector<1x1xf32>
    %30 = arith.divf %28, %29 : vector<1x1xf32>
    %31 = vector.broadcast %30 : vector<1x1xf32> to vector<1x128xf32>
    %32 = arith.subf %24, %31 : vector<1x128xf32>
    %33 = arith.mulf %32, %32 : vector<1x128xf32>
    %cst_12 = arith.constant dense<0.000000e+00> : vector<1xf32>
    %34 = vector.multi_reduction <add>, %33, %cst_12 [1] : vector<1x128xf32> to vector<1xf32>
    %35 = vector.shape_cast %34 : vector<1xf32> to vector<1x1xf32>
    %cst_13 = arith.constant 1.280000e+02 : f32
    %36 = vector.broadcast %cst_13 : f32 to vector<1x1xf32>
    %37 = arith.divf %35, %36 : vector<1x1xf32>
    %38 = vector.broadcast %30 : vector<1x1xf32> to vector<1x128xf32>
    %39 = arith.subf %24, %38 : vector<1x128xf32>
    %cst_14 = arith.constant 9.99999974E-6 : f32
    %40 = vector.broadcast %cst_14 : f32 to vector<1x1xf32>
    %41 = arith.addf %37, %40 : vector<1x1xf32>
    %42 = math.rsqrt %41 : vector<1x1xf32>
    %43 = vector.broadcast %42 : vector<1x1xf32> to vector<1x128xf32>
    %44 = arith.mulf %39, %43 : vector<1x128xf32>
    %45 = arith.mulf %44, %25 : vector<1x128xf32>
    %46 = arith.addf %45, %26 : vector<1x128xf32>
    %c0_15 = arith.constant 0 : index
    %c0_16 = arith.constant 0 : index
    %47 = vector.load %arg1[%c0_15, %c0_16] : memref<128x256xf32, #tpu.memory_space<vmem>>, vector<128x256xf32>
    %cst_17 = arith.constant dense<0.000000e+00> : vector<1x256xf32>
    %48 = tpu.matmul %46, %47, %cst_17 {dimension_numbers = #tpu.dot_dimension_numbers<[1], [0], [0], [1], [0, 0, 1, 1], [], []>} : vector<1x128xf32>, vector<128x256xf32>, vector<1x256xf32> -> vector<1x256xf32>
    %c0_18 = arith.constant 0 : index
    %c0_19 = arith.constant 0 : index
    %49 = vector.load %arg4[%c0_18, %c0_19] : memref<8x256xf32, #tpu.memory_space<vmem>>, vector<1x256xf32>
    %50 = arith.addf %48, %49 : vector<1x256xf32>
    %cst_20 = arith.constant 0.000000e+00 : f32
    %51 = vector.broadcast %cst_20 : f32 to vector<1x256xf32>
    %52 = arith.maximumf %50, %51 : vector<1x256xf32>
    %c0_21 = arith.constant 0 : index
    %c0_22 = arith.constant 0 : index
    %53 = vector.load %arg2[%c0_21, %c0_22] : memref<256x128xf32, #tpu.memory_space<vmem>>, vector<256x128xf32>
    %cst_23 = arith.constant dense<0.000000e+00> : vector<1x128xf32>
    %54 = tpu.matmul %52, %53, %cst_23 {dimension_numbers = #tpu.dot_dimension_numbers<[1], [0], [0], [1], [0, 0, 1, 1], [], []>} : vector<1x256xf32>, vector<256x128xf32>, vector<1x128xf32> -> vector<1x128xf32>
    %c1_24 = arith.constant 1 : index
    %c0_25 = arith.constant 0 : index
    %55 = vector.load %arg4[%c1_24, %c0_25] : memref<8x256xf32, #tpu.memory_space<vmem>>, vector<1x128xf32>
    %56 = arith.addf %54, %55 : vector<1x128xf32>
    %cst_26 = arith.constant 0.000000e+00 : f32
    %57 = vector.broadcast %cst_26 : f32 to vector<1x128xf32>
    %58 = arith.maximumf %56, %57 : vector<1x128xf32>
    %c0_27 = arith.constant 0 : index
    %c0_28 = arith.constant 0 : index
    %59 = vector.load %arg3[%c0_27, %c0_28] : memref<128x128xf32, #tpu.memory_space<vmem>>, vector<128x128xf32>
    %cst_29 = arith.constant dense<0.000000e+00> : vector<1x128xf32>
    %60 = tpu.matmul %58, %59, %cst_29 {dimension_numbers = #tpu.dot_dimension_numbers<[1], [0], [0], [1], [0, 0, 1, 1], [], []>} : vector<1x128xf32>, vector<128x128xf32>, vector<1x128xf32> -> vector<1x128xf32>
    %c2_30 = arith.constant 2 : index
    %c0_31 = arith.constant 0 : index
    %61 = vector.load %arg4[%c2_30, %c0_31] : memref<8x256xf32, #tpu.memory_space<vmem>>, vector<1x128xf32>
    %62 = arith.addf %60, %61 : vector<1x128xf32>
    %63 = vector.shape_cast %62 : vector<1x128xf32> to vector<1x128xf32>
    %64 = vector.broadcast %63 : vector<1x128xf32> to vector<8x128xf32>
    %c0_32 = arith.constant 0 : index
    %c0_33 = arith.constant 0 : index
    %65 = vector.load %arg5[%c0_32, %c0_33] : memref<8x128xf32, #tpu.memory_space<vmem>>, vector<8x128xf32>
    tpu.vector_store %arg5[%c0_32, %c0_33], %64 {strides = array<i32>} : memref<8x128xf32, #tpu.memory_space<vmem>>, vector<8x128xf32>,
    return
  }
}

</mosaic_0001>

<bundles_post_ra>
// kernel: tpu_custom_call.1
= control target key start
LH: loop header
LB: loop body
LE: loop exit
PB: predicated region body
PF: predicated region fallthrough
CT: control target
= control target key end

     0   :  { %10 = vsyncpa [#allocation3], 0  ;;  %s918_s0 = inlined_call_operand.hbm [shape: f32[8,128], index: 0, kind: input, shape index: {}]   ;;  %s919_s1 = inlined_call_operand.hbm [shape: f32[128,256], index: 1, kind: input, shape index: {}]   ;;  %s920_s2 = inlined_call_operand.hbm [shape: f32[256,128], index: 2, kind: input, shape index: {}]   ;;  %s921_s3 = inlined_call_operand.hbm [shape: f32[128,128], index: 3, kind: input, shape index: {}]   ;;  %s922_s4 = inlined_call_operand.hbm [shape: f32[8,256], index: 4, kind: input, shape index: {}]   ;;  %s923_s5 = inlined_call_operand.hbm [shape: f32[8,128], index: 5, kind: output, shape index: {}]  }
   0x1   :  { %11 = vsyncpa [#allocation6], 0 }
   0x2   :  { %12 = vsyncpa [#allocation9], 0 }
   0x3   :  { %13 = vsyncpa [#allocation4], 0  ;;  %s786_s18 = smov [#allocation5]   ;;  %s646_s22 = scalar_lea.hbm %s919_s1, 4096 }
   0x4   :  { %s29_s19 = sshll.u32 %s786_s18, 4  ;;  %p647_p0 = scmp.ne.s32.totalorder %s919_s1, %s646_s22  ;;  %s30_s19 = int_to_ptr.vmem [resolvable:$true] %s29_s19 }
   0x5   :  { %p650_p1 = scmp.lt.u32.totalorder %s646_s22, %s919_s1 }
   0x7   :  { %p652_p2 = pnand %p650_p1, %p647_p0 }
   0x9   :  { %655 = shalt.err (!%p652_p2)
}
   0xa   :  { %s656_s27 = scalar_lea.vmem %s30_s19, 4096  ;;  %p661_p4 = scmp.lt.s32.totalorder %s30_s19, %s30_s19 }
   0xb   :  { %p657_p3 = scmp.ne.s32.totalorder %s30_s19, %s656_s27  ;;  %p662_p5 = scmp.lt.s32.totalorder %s656_s27, %s656_s27 }
   0xd   :  { %p663_p6 = por %p662_p5, %p661_p4 }
   0xf   :  { %p664_p7 = pnand %p663_p6, %p657_p3 }
  0x11   :  { %667 = shalt.err (!%p664_p7)
}
  0x12   :  { %s787_s28 = smov 256   ;;  %s788_s29 = smov 16  }
  0x13   :  { %35 = dma.hbm_to_vmem [thread:$0]  %s919_s1, 4096, %s30_s19, [#allocation6], %s787_s28, %s787_s28, %s788_s29  }
  0x14   :  { %s789_s7 = smov [#allocation8]   ;;  %s790_s9 = smov [#allocation2]  }
  0x15   :  { %s53_s8 = sshll.u32 %s789_s7, 4  ;;  %s20_s10 = sshll.u32 %s790_s9, 4  ;;  %s54_s8 = int_to_ptr.vmem [resolvable:$true] %s53_s8  ;;  %s21_s10 = int_to_ptr.vmem [resolvable:$true] %s20_s10 }
  0x16   :  { %s668_s13 = scalar_lea.hbm %s921_s3, 2048 }
  0x17   :  { %p669_p8 = scmp.ne.s32.totalorder %s921_s3, %s668_s13  ;;  %p672_p9 = scmp.lt.u32.totalorder %s668_s13, %s921_s3 }
  0x19   :  { %p674_p10 = pnand %p672_p9, %p669_p8 }
  0x1b   :  { %677 = shalt.err (!%p674_p10)
}
  0x1c   :  { %s678_s1 = scalar_lea.vmem %s54_s8, 2048  ;;  %p683_p12 = scmp.lt.s32.totalorder %s54_s8, %s54_s8 }
  0x1d   :  { %p679_p11 = scmp.ne.s32.totalorder %s54_s8, %s678_s1  ;;  %p684_p13 = scmp.lt.s32.totalorder %s678_s1, %s678_s1 }
  0x1f   :  { %p685_p0 = por %p684_p13, %p683_p12 }
  0x21   :  { %p686_p1 = pnand %p685_p0, %p679_p11 }
  0x23   :  { %689 = shalt.err (!%p686_p1)
}
  0x24   :  { %s791_s18 = smov 128   ;;  %s792_s19 = smov 8  }
  0x25   :  { %59 = dma.hbm_to_vmem [thread:$0]  %s921_s3, 2048, %s54_s8, [#allocation9], %s791_s18, %s791_s18, %s792_s19  }
  0x26   :  { %s690_s24 = scalar_lea.hbm %s918_s0, 128 }
  0x27   :  { %p691_p2 = scmp.ne.s32.totalorder %s918_s0, %s690_s24  ;;  %p694_p3 = scmp.lt.u32.totalorder %s690_s24, %s918_s0 }
  0x29   :  { %p696_p4 = pnand %p694_p3, %p691_p2 }
  0x2b   :  { %699 = shalt.err (!%p696_p4)
}
  0x2c   :  { %s700_s29 = scalar_lea.vmem %s21_s10, 128  ;;  %p705_p6 = scmp.lt.s32.totalorder %s21_s10, %s21_s10 }
  0x2d   :  { %p701_p5 = scmp.ne.s32.totalorder %s21_s10, %s700_s29  ;;  %p706_p7 = scmp.lt.s32.totalorder %s700_s29, %s700_s29 }
  0x2f   :  { %p707_p8 = por %p706_p7, %p705_p6 }
  0x31   :  { %p708_p9 = pnand %p707_p8, %p701_p5 }
  0x33   :  { %711 = shalt.err (!%p708_p9)
}
  0x34   :  { %23 = dma.hbm_to_vmem [thread:$0]  %s918_s0, 128, %s21_s10, [#allocation3]  }
  0x35   :  { %s793_s6 = smov [#allocation7]   ;;  %s794_s8 = smov [#allocation10]  }
  0x36   :  { %s41_s7 = sshll.u32 %s793_s6, 4  ;;  %s66_s9 = sshll.u32 %s794_s8, 4  ;;  %s42_s7 = int_to_ptr.vmem [resolvable:$true] %s41_s7  ;;  %s67_s9 = int_to_ptr.vmem [resolvable:$true] %s66_s9 }
  0x37   :  { %s712_s13 = scalar_lea.hbm %s920_s2, 4096 }
  0x38   :  { %p713_p10 = scmp.ne.s32.totalorder %s920_s2, %s712_s13  ;;  %p716_p11 = scmp.lt.u32.totalorder %s712_s13, %s920_s2 }
  0x3a   :  { %p718_p12 = pnand %p716_p11, %p713_p10 }
  0x3c   :  { %721 = shalt.err (!%p718_p12)
}
  0x3d   :  { %s722_s0 = scalar_lea.vmem %s42_s7, 4096  ;;  %p727_p0 = scmp.lt.s32.totalorder %s42_s7, %s42_s7 }
  0x3e   :  { %p723_p13 = scmp.ne.s32.totalorder %s42_s7, %s722_s0  ;;  %p728_p1 = scmp.lt.s32.totalorder %s722_s0, %s722_s0 }
  0x40   :  { %p729_p2 = por %p728_p1, %p727_p0 }
  0x42   :  { %p730_p3 = pnand %p729_p2, %p723_p13 }
  0x44   :  { %733 = shalt.err (!%p730_p3)
}
  0x45   :  { %47 = dma.hbm_to_vmem [thread:$0]  %s920_s2, 4096, %s42_s7, [#allocation6], %s791_s18, %s791_s18, %s792_s19  }
  0x46   :  { %s734_s22 = scalar_lea.hbm %s922_s4, 256 }
  0x47   :  { %p735_p4 = scmp.ne.s32.totalorder %s922_s4, %s734_s22  ;;  %p738_p5 = scmp.lt.u32.totalorder %s734_s22, %s922_s4 }
  0x49   :  { %p740_p6 = pnand %p738_p5, %p735_p4 }
  0x4b   :  { %743 = shalt.err (!%p740_p6)
}
  0x4c   :  { %s744_s27 = scalar_lea.vmem %s67_s9, 256  ;;  %p749_p8 = scmp.lt.s32.totalorder %s67_s9, %s67_s9 }
  0x4d   :  { %p745_p7 = scmp.ne.s32.totalorder %s67_s9, %s744_s27  ;;  %p750_p9 = scmp.lt.s32.totalorder %s744_s27, %s744_s27 }
  0x4f   :  { %p751_p10 = por %p750_p9, %p749_p8 }
  0x51   :  { %p752_p11 = pnand %p751_p10, %p745_p7 }
  0x53   :  { %755 = shalt.err (!%p752_p11)
}
  0x54   :  { %69 = dma.hbm_to_vmem [thread:$0]  %s922_s4, 256, %s67_s9, [#allocation9]  }
  0x55   :  { %778 = dma.done.wait [#allocation3], 128  }
  0x56   :  { %779 = vsyncadd [#allocation3], 4294967168 }
  0x57   :  { %780 = dma.done.wait [#allocation6], 8192  }
  0x58   :  { %781 = vsyncadd [#allocation6], 4294959104 }
  0x59   :  { %782 = dma.done.wait [#allocation9], 2304  }
  0x5a   :  { %783 = vsyncadd [#allocation9], 4294964992  ;;  %v85_v0 = vld [vmem:[#allocation2] sm:$0x1]  ;;  %v86_v1 = vld [vmem:[#allocation2 + $0x1] sm:$0x1] }
  0x5b   :  { %vm90_vm0 = vcmask 1040384   ;;  %v87_v2 = vadd.f32 %v86_v1, %v85_v0  ;;  %v88_v13 = vld [vmem:[#allocation2 + $0x2] sm:$0x1]  ;;  %v89_v15 = vld [vmem:[#allocation2 + $0x3] sm:$0x1]  ;;  %v125_v19 = vld [vmem:[#allocation5 + $0x8] sm:$0xff] }
  0x5c   :  { %v127_v20 = vld [vmem:[#allocation5 + $0x18] sm:$0xff]  ;;  %v124_v21 = vld [vmem:[#allocation5] sm:$0xff]  ;;  %v126_v23 = vld [vmem:[#allocation5 + $0x10] sm:$0xff]  ;;  %v795_v61 = vmov 0.0   ;;  %vm797_vm1 = vmmov 0   ;;  %s798_s4 = smov [#allocation11]  }
  0x5d   :  { %v91_v3 = vsel %vm90_vm0, %v87_v2, 0.0  ;;  %v541_v22 = vpack.c.bf16 %v127_v20, %v125_v19  ;;  %v129_v24 = vld [vmem:[#allocation5 + $0x28] sm:$0xff]  ;;  %v131_v25 = vld [vmem:[#allocation5 + $0x38] sm:$0xff]  ;;  %v543_v26 = vpack.c.bf16 %v126_v23, %v124_v21  ;;  %v128_v28 = vld [vmem:[#allocation5 + $0x20] sm:$0xff]  ;;  %232 = vmatprep.mubr.f32.mxu0 %v795_v61  ;;  %s443_s19 = sshll.u32 %s798_s4, 4  ;;  %s444_s19 = int_to_ptr.vmem [resolvable:$true] %s443_s19 }
  0x5e   :  { %92 = vadd.xlane.f32.xlu0 %v91_v3  ;;  %v545_v27 = vpack.c.bf16 %v131_v25, %v129_v24  ;;  %v130_v29 = vld [vmem:[#allocation5 + $0x30] sm:$0xff]  ;;  %v133_v30 = vld [vmem:[#allocation5 + $0x48] sm:$0xff]  ;;  %v135_v31 = vld [vmem:[#allocation5 + $0x58] sm:$0xff]  ;;  %s756_s28 = scalar_lea.vmem %s444_s19, 128  ;;  %p761_p13 = scmp.lt.s32.totalorder %s444_s19, %s444_s19 }
  0x5f   :  { %542 = vmatprep.subr.bf16.mxu0 %v541_v22  ;;  %v547_v32 = vpack.c.bf16 %v130_v29, %v128_v28  ;;  %v549_v33 = vpack.c.bf16 %v135_v31, %v133_v30  ;;  %v132_v34 = vld [vmem:[#allocation5 + $0x40] sm:$0xff]  ;;  %v134_v35 = vld [vmem:[#allocation5 + $0x50] sm:$0xff]  ;;  %v137_v42 = vld [vmem:[#allocation5 + $0x68] sm:$0xff]  ;;  %p757_p12 = scmp.ne.s32.totalorder %s444_s19, %s756_s28  ;;  %p762_p0 = scmp.lt.s32.totalorder %s756_s28, %s756_s28 }
  0x60   :  { %544 = vmatpush1.bf16.msra.mxu0 %v543_v26  ;;  %v551_v36 = vpack.c.bf16 %v134_v35, %v132_v34  ;;  %v139_v43 = vld [vmem:[#allocation5 + $0x78] sm:$0xff]  ;;  %v136_v45 = vld [vmem:[#allocation5 + $0x60] sm:$0xff]  ;;  %v138_v46 = vld [vmem:[#allocation5 + $0x70] sm:$0xff] }
  0x61   :  { %546 = vmatprep.subr.bf16.mxu0 %v545_v27  ;;  %v553_v44 = vpack.c.bf16 %v139_v43, %v137_v42  ;;  %v555_v47 = vpack.c.bf16 %v138_v46, %v136_v45  ;;  %v141_v48 = vld [vmem:[#allocation5 + $0x88] sm:$0xff]  ;;  %v143_v49 = vld [vmem:[#allocation5 + $0x98] sm:$0xff]  ;;  %v140_v51 = vld [vmem:[#allocation5 + $0x80] sm:$0xff]  ;;  %p763_p1 = por %p762_p0, %p761_p13 }
  0x62   :  { %v557_v50 = vpack.c.bf16 %v143_v49, %v141_v48  ;;  %v142_v52 = vld [vmem:[#allocation5 + $0x90] sm:$0xff]  ;;  %v145_v54 = vld [vmem:[#allocation5 + $0xa8] sm:$0xff]  ;;  %v147_v55 = vld [vmem:[#allocation5 + $0xb8] sm:$0xff] }
  0x63   :  { %v559_v53 = vpack.c.bf16 %v142_v52, %v140_v51  ;;  %v144_v56 = vld [vmem:[#allocation5 + $0xa0] sm:$0xff]  ;;  %v561_v57 = vpack.c.bf16 %v147_v55, %v145_v54  ;;  %v146_v58 = vld [vmem:[#allocation5 + $0xb0] sm:$0xff]  ;;  %v149_v59 = vld [vmem:[#allocation5 + $0xc8] sm:$0xff]  ;;  %p764_p2 = pnand %p763_p1, %p757_p12 }
  0x64   :  { %548 = vmatpush1.bf16.msra.mxu0 %v547_v32  ;;  %v151_v60 = vld [vmem:[#allocation5 + $0xd8] sm:$0xff]  ;;  %v563_v62 = vpack.c.bf16 %v146_v58, %v144_v56  ;;  %v148_v0 = vld [vmem:[#allocation5 + $0xc0] sm:$0xff]  ;;  %v150_v1 = vld [vmem:[#allocation5 + $0xd0] sm:$0xff] }
  0x65   :  { %550 = vmatprep.subr.bf16.mxu0 %v549_v33  ;;  %v565_v63 = vpack.c.bf16 %v151_v60, %v149_v59  ;;  %v155_v3 = vld [vmem:[#allocation5 + $0xf8] sm:$0xff]  ;;  %v261_v20 = vld [vmem:[#allocation7 + $0xa0] sm:$0xff]  ;;  %v262_v21 = vld [vmem:[#allocation7 + $0xa8] sm:$0xff] }
  0x66   :  { %v244_v19 = vld [vmem:[#allocation7 + $0x18] sm:$0xff]  ;;  %v581_v23 = vpack.c.bf16 %v262_v21, %v261_v20  ;;  %v245_v24 = vld [vmem:[#allocation7 + $0x20] sm:$0xff]  ;;  %v246_v25 = vld [vmem:[#allocation7 + $0x28] sm:$0xff] }
  0x67   :  { %v263_v26 = vld [vmem:[#allocation7 + $0xb0] sm:$0xff]  ;;  %v264_v27 = vld [vmem:[#allocation7 + $0xb8] sm:$0xff]  ;;  %v583_v28 = vpack.c.bf16 %v246_v25, %v245_v24  ;;  %v265_v32 = vld [vmem:[#allocation7 + $0xc0] sm:$0xff] }
  0x68   :  { %552 = vmatpush1.bf16.msra.mxu0 %v551_v36  ;;  %v585_v29 = vpack.c.bf16 %v264_v27, %v263_v26  ;;  %v247_v30 = vld [vmem:[#allocation7 + $0x30] sm:$0xff]  ;;  %v248_v31 = vld [vmem:[#allocation7 + $0x38] sm:$0xff]  ;;  %v266_v33 = vld [vmem:[#allocation7 + $0xc8] sm:$0xff] }
  0x69   :  { %554 = vmatprep.subr.bf16.mxu0 %v553_v44  ;;  %v587_v34 = vpack.c.bf16 %v248_v31, %v247_v30  ;;  %v589_v35 = vpack.c.bf16 %v266_v33, %v265_v32  ;;  %v249_v36 = vld [vmem:[#allocation7 + $0x40] sm:$0xff]  ;;  %v251_v43 = vld [vmem:[#allocation7 + $0x50] sm:$0xff]  ;;  %v252_v44 = vld [vmem:[#allocation7 + $0x58] sm:$0xff] }
  0x6a   :  { %v269_v45 = vld [vmem:[#allocation7 + $0xe0] sm:$0xff]  ;;  %v270_v46 = vld [vmem:[#allocation7 + $0xe8] sm:$0xff]  ;;  %v108_v55 = vld [vmem:[#allocation2 + $0x5] sm:$0x1] }
  0x6b   :  { %v597_v48 = vpack.c.bf16 %v270_v46, %v269_v45  ;;  %v253_v58 = vld [vmem:[#allocation7 + $0x60] sm:$0xff]  ;;  %v254_v59 = vld [vmem:[#allocation7 + $0x68] sm:$0xff]  ;;  %v356_v20 = vld [vmem:[#allocation8 + $0x58] sm:$0xff] }
  0x6c   :  { %556 = vmatpush1.bf16.msra.mxu0 %v555_v47  ;;  %v595_v47 = vpack.c.bf16 %v252_v44, %v251_v43  ;;  %v599_v60 = vpack.c.bf16 %v254_v59, %v253_v58  ;;  %v156_v25 = vld [vmem:[#allocation10] ss:$8 sm:$0x3]  ;;  %v273_v43 = vld [vmem:[#allocation10 + $0x1] ss:$0 sm:$0xff] }
  0x6d   :  { %558 = vmatprep.subr.bf16.mxu0 %v557_v50 }
  0x70   :  { %560 = vmatpush1.bf16.msra.mxu0 %v559_v53  ;;  %v107_v53 = vld [vmem:[#allocation2 + $0x4] sm:$0x1] }
  0x71   :  { %562 = vmatprep.subr.bf16.mxu0 %v561_v57 }
  0x74   :  { %564 = vmatpush1.bf16.msra.mxu0 %v563_v62  ;;  %v271_v62 = vld [vmem:[#allocation7 + $0xf0] sm:$0xff] }
  0x75   :  { %566 = vmatprep.subr.bf16.mxu0 %v565_v63  ;;  %v272_v63 = vld [vmem:[#allocation7 + $0xf8] sm:$0xff] }
  0xeb   :  { %v93_v4 = vpop.xlane.xlu0 %92 }
  0xec   :  { %v95_v5 = vmul.f32 0.0078125, %v93_v4  ;;  %v567_v4 = vpack.c.bf16 %v150_v1, %v148_v0  ;;  %v601_v0 = vpack.c.bf16 %v272_v63, %v271_v62  ;;  %v255_v1 = vld [vmem:[#allocation7 + $0x70] sm:$0xff] }
  0xee   :  { %v96_v6 = vsub.f32 %v87_v2, %v95_v5  ;;  %v153_v2 = vld [vmem:[#allocation5 + $0xe8] sm:$0xff]  ;;  %568 = vmatpush1.bf16.msra.mxu0 %v567_v4  ;;  %v345_v4 = vld [vmem:[#allocation8] sm:$0xff] }
  0xef   :  { %v569_v5 = vpack.c.bf16 %v155_v3, %v153_v2  ;;  %v256_v2 = vld [vmem:[#allocation7 + $0x78] sm:$0xff] }
  0xf0   :  { %v97_v7 = vmul.f32 %v96_v6, %v96_v6  ;;  %v603_v3 = vpack.c.bf16 %v256_v2, %v255_v1 }
  0xf1   :  { %570 = vmatprep.subr.bf16.mxu0 %v569_v5  ;;  %v346_v5 = vld [vmem:[#allocation8 + $0x8] sm:$0xff] }
  0xf2   :  { %v98_v8 = vsel %vm90_vm0, %v97_v7, 0.0  ;;  %v154_v7 = vld [vmem:[#allocation5 + $0xf0] sm:$0xff] }
  0xf3   :  { %99 = vadd.xlane.f32.xlu0 %v98_v8 }
 0x180   :  { %v100_v9 = vpop.xlane.xlu0 %99 }
 0x181   :  { %v101_v10 = vmul.f32 0.0078125, %v100_v9  ;;  %v257_v9 = vld [vmem:[#allocation7 + $0x80] sm:$0xff] }
 0x183   :  { %v102_v11 = vadd.f32 1e-05, %v101_v10  ;;  %v258_v10 = vld [vmem:[#allocation7 + $0x88] sm:$0xff] }
 0x185   :  { %642 = vrsqrt.f32 %v102_v11  ;;  %v241_v11 = vld [vmem:[#allocation7] sm:$0xff] }
 0x18f   :  { %v643_v12 = vpop.eup %642 }
 0x190   :  { %v104_v14 = vmul.f32 %v643_v12, %v96_v6  ;;  %v152_v6 = vld [vmem:[#allocation5 + $0xe0] sm:$0xff]  ;;  %v573_v12 = vpack.c.bf16 %v258_v10, %v257_v9 }
 0x191   :  { %v571_v8 = vpack.c.bf16 %v154_v7, %v152_v6  ;;  %v347_v6 = vld [vmem:[#allocation8 + $0x10] sm:$0xff]  ;;  %v606_v7 = vpack.c.bf16 %v346_v5, %v345_v4  ;;  %v349_v10 = vld [vmem:[#allocation8 + $0x20] sm:$0xff] }
 0x192   :  { %v105_v16 = vmul.f32 %v104_v14, %v88_v13  ;;  %v242_v13 = vld [vmem:[#allocation7 + $0x8] sm:$0xff]  ;;  %v259_v14 = vld [vmem:[#allocation7 + $0x90] sm:$0xff]  ;;  %574 = vmatprep.subr.bf16.mxu1 %v573_v12 }
 0x193   :  { %572 = vmatpush1.bf16.msra.mxu0 %v571_v8  ;;  %v348_v8 = vld [vmem:[#allocation8 + $0x18] sm:$0xff] }
 0x194   :  { %v106_v17 = vadd.f32 %v105_v16, %v89_v15  ;;  %v260_v15 = vld [vmem:[#allocation7 + $0x98] sm:$0xff]  ;;  %v575_v16 = vpack.c.bf16 %v242_v13, %v241_v11  ;;  %v609_v9 = vpack.c.bf16 %v348_v8, %v347_v6  ;;  %v350_v11 = vld [vmem:[#allocation8 + $0x28] sm:$0xff]  ;;  %v351_v13 = vld [vmem:[#allocation8 + $0x30] sm:$0xff] }
 0x195   :  { %v612_v12 = vpack.c.bf16 %v350_v11, %v349_v10 }
 0x196   :  { %v109_v18 = vsel %vm90_vm0, %v106_v17, 0.0  ;;  %576 = vmatpush3.bf16.msra.mxu1 %v575_v16  ;;  %v353_v16 = vld [vmem:[#allocation8 + $0x40] sm:$0xff] }
 0x197   :  { %110 = vadd.xlane.f32.xlu1 %v109_v18  ;;  %v243_v18 = vld [vmem:[#allocation7 + $0x10] sm:$0xff] }
 0x198   :  { %v579_v22 = vpack.c.bf16 %v244_v19, %v243_v18  ;;  %v355_v19 = vld [vmem:[#allocation8 + $0x50] sm:$0xff] }
 0x199   :  { %v621_v21 = vpack.c.bf16 %v356_v20, %v355_v19 }
 0x224   :  { %v111_v37 = vpop.xlane.xlu1 %110 }
 0x225   :  { %v112_v38 = vmul.f32 0.0078125, %v111_v37  ;;  %v250_v37 = vld [vmem:[#allocation7 + $0x48] sm:$0xff] }
 0x227   :  { %v898_v39 = vsub.f32 %v106_v17, %v112_v38  ;;  %v577_v17 = vpack.c.bf16 %v260_v15, %v259_v14  ;;  %v267_v38 = vld [vmem:[#allocation7 + $0xd0] sm:$0xff]  ;;  %v352_v14 = vld [vmem:[#allocation8 + $0x38] sm:$0xff] }
 0x228   :  { %v615_v15 = vpack.c.bf16 %v352_v14, %v351_v13 }
 0x229   :  { %v114_v40 = vmul.f32 %v898_v39, %v898_v39  ;;  %578 = vmatprep.subr.bf16.mxu1 %v577_v17  ;;  %v354_v17 = vld [vmem:[#allocation8 + $0x48] sm:$0xff] }
 0x22a   :  { %580 = vmatpush3.bf16.msra.mxu1 %v579_v22  ;;  %v618_v18 = vpack.c.bf16 %v354_v17, %v353_v16  ;;  %v158_v22 = vlaneseq }
 0x22b   :  { %v115_v41 = vsel %vm90_vm0, %v114_v40, 0.0  ;;  %582 = vmatprep.subr.bf16.mxu1 %v581_v23  ;;  %v268_v40 = vld [vmem:[#allocation7 + $0xd8] sm:$0xff] }
 0x22c   :  { %116 = vadd.xlane.f32.xlu1 %v115_v41  ;;  %v591_v41 = vpack.c.bf16 %v250_v37, %v249_v36  ;;  %v593_v42 = vpack.c.bf16 %v268_v40, %v267_v38  ;;  %v159_v23 = vshrl.u32 %v158_v22, 7  ;;  %v358_v36 = vld [vmem:[#allocation8 + $0x68] sm:$0xff]  ;;  %v359_v38 = vld [vmem:[#allocation8 + $0x70] sm:$0xff]  ;;  %v360_v40 = vld [vmem:[#allocation8 + $0x78] sm:$0xff] }
 0x22e   :  { %584 = vmatpush3.bf16.msra.mxu1 %v583_v28  ;;  %v160_v24 = vsub.s32 0, %v159_v23  ;;  %v164_v26 = vsub.s32 1, %v159_v23 }
 0x22f   :  { %586 = vmatprep.subr.bf16.mxu1 %v585_v29 }
 0x230   :  { %v161_v27 = vrot.slane %v156_v25, %v160_v24  ;;  %v165_v28 = vrot.slane %v156_v25, %v164_v26 }
 0x232   :  { %588 = vmatpush3.bf16.msra.mxu1 %v587_v34 }
 0x233   :  { %590 = vmatprep.subr.bf16.mxu1 %v589_v35  ;;  %v357_v35 = vld [vmem:[#allocation8 + $0x60] sm:$0xff] }
 0x234   :  { %v624_v37 = vpack.c.bf16 %v358_v36, %v357_v35 }
 0x236   :  { %592 = vmatpush3.bf16.msra.mxu1 %v591_v41  ;;  %v627_v41 = vpack.c.bf16 %v360_v40, %v359_v38 }
 0x237   :  { %594 = vmatprep.subr.bf16.mxu1 %v593_v42 }
 0x23a   :  { %596 = vmatpush3.bf16.msra.mxu1 %v595_v47 }
 0x23b   :  { %598 = vmatprep.subr.bf16.mxu1 %v597_v48  ;;  %v361_v48 = vld [vmem:[#allocation10 + $0x2] ss:$0 sm:$0xff] }
 0x23e   :  { %600 = vmatpush3.bf16.msra.mxu1 %v599_v60 }
 0x23f   :  { %602 = vmatprep.subr.bf16.mxu1 %v601_v0 }
 0x242   :  { %604 = vmatpush3.bf16.msra.mxu1 %v603_v3 }
 0x2b9   :  { %v117_v49 = vpop.xlane.xlu1 %116 }
 0x2ba   :  { %v118_v50 = vmul.f32 0.0078125, %v117_v49 }
 0x2bc   :  { %v119_v51 = vadd.f32 1e-05, %v118_v50 }
 0x2be   :  { %644 = vrsqrt.f32 %v119_v51 }
 0x2c8   :  { %v645_v52 = vpop.eup %644 }
 0x2c9   :  { %v121_v54 = vmul.f32 %v645_v52, %v898_v39  ;;  %v796_v39 = vmov 0.0|0.0  }
 0x2ca   :  { %605 = vmatprep.subr.bf16.mxu0 %v796_v39 }
 0x2cb   :  { %v122_v56 = vmul.f32 %v121_v54, %v107_v53 }
 0x2cd   :  { %v123_v57 = vadd.f32 %v122_v56, %v108_v55 }
 0x2cf   :  { %233 = vmatmul.mubr.f32.vlgmr.msra.gmra.mrb[0].mxu0 %v123_v57 }
 0x2d0   :  { %607 = vmatpush3.bf16.msra.mxu0 %v606_v7  ;;  %538 = vmatprep.mubr.msk.f32.mxu0 %vm797_vm1, %v795_v61 }
 0x2d1   :  { %608 = vmatprep.subr.bf16.mxu0 %v796_v39 }
 0x2d4   :  { %610 = vmatpush3.bf16.msra.mxu0 %v609_v9 }
 0x2d5   :  { %611 = vmatprep.subr.bf16.mxu0 %v796_v39 }
 0x2d8   :  { %613 = vmatpush3.bf16.msra.mxu0 %v612_v12 }
 0x2d9   :  { %614 = vmatprep.subr.bf16.mxu0 %v796_v39 }
 0x2dc   :  { %616 = vmatpush3.bf16.msra.mxu0 %v615_v15 }
 0x2dd   :  { %617 = vmatprep.subr.bf16.mxu0 %v796_v39 }
 0x2e0   :  { %619 = vmatpush3.bf16.msra.mxu0 %v618_v18 }
 0x2e1   :  { %620 = vmatprep.subr.bf16.mxu0 %v796_v39 }
 0x2e4   :  { %622 = vmatpush3.bf16.msra.mxu0 %v621_v21 }
 0x2e5   :  { %623 = vmatprep.subr.bf16.mxu0 %v796_v39 }
 0x2e8   :  { %625 = vmatpush3.bf16.msra.mxu0 %v624_v37 }
 0x2e9   :  { %626 = vmatprep.subr.bf16.mxu0 %v796_v39 }
 0x2ec   :  { %628 = vmatpush3.bf16.msra.mxu0 %v627_v41 }
 0x3a2   :  { %v234_v29 = vpop.f32.mrb[0].mxu0 }
 0x3a3   :  { %v235_v30 = vadd.f32 %v234_v29, %v161_v27  ;;  %v236_v31 = vpop.f32.mrb[1].mxu0 }
 0x3a4   :  { %v237_v32 = vadd.f32 %v236_v31, %v165_v28 }
 0x3a5   :  { %v239_v34 = vmax.f32 %v235_v30, 0.0 }
 0x3a6   :  { %v240_v33 = vmax.f32 %v237_v32, 0.0 }
 0x3a8   :  { %338 = vmatprep.mubr.f32.mxu1 %v240_v33 }
 0x3a9   :  { %339 = vmatmul.mubr.f32.vlgmr.msra.gmra.mrb[0].mxu1 %v239_v34 }
 0x47c   :  { %v486_v42 = vpop.f32.mrb[0].mxu1 }
 0x47d   :  { %v487_v44 = vpop.f32.mrb[1].mxu1 }
 0x47e   :  { %v488_v45 = vadd.f32 %v487_v44, %v486_v42 }
 0x480   :  { %v341_v46 = vadd.f32 %v488_v45, %v273_v43 }
 0x482   :  { %v344_v47 = vmax.f32 %v341_v46, 0.0 }
 0x484   :  { %539 = vmatmul.mubr.f32.vlgmr.msra.gmra.mrb[2].mxu0 %v344_v47 }
 0x557   :  { %v428_v49 = vpop.f32.mrb[2].mxu0 }
 0x558   :  { %v429_v50 = vadd.f32 %v428_v49, %v361_v48  ;;  %v540_v51 = vpop.f32.mrb[3].mxu0 }
 0x55a   :  { %v435_v52 = vrot.slane %v429_v50, %v160_v24 }
 0x55c   :  { %436 = vst [vmem:[#allocation11] sm:$0xff] %v435_v52 }
 0x55d   :  { %767 = shalt.err (!%p764_p2)
}
 0x55e   :  { %s768_s30 = scalar_lea.hbm %s923_s5, 128 }
 0x55f   :  { %p769_p3 = scmp.ne.s32.totalorder %s923_s5, %s768_s30  ;;  %p772_p4 = scmp.lt.u32.totalorder %s768_s30, %s923_s5 }
 0x561   :  { %p774_p5 = pnand %p772_p4, %p769_p3 }
 0x563   :  { %777 = shalt.err (!%p774_p5)
}
 0x564   :  { %446 = dma.vmem_to_hbm [thread:$0]  %s444_s19, 128, %s923_s5, [#allocation4]  }
 0x565   :  { %784 = dma.done.wait [#allocation4], 128  }
 0x566   :  { %785 = vsyncadd [#allocation4], 4294967168 }
 0x567   :  { %450 = vsyncpa [#allocation3], 1 }
 0x568   :  { %451 = vsyncpa [#allocation6], 1 }
 0x569   :  { %452 = vsyncpa [#allocation9], 1 }
 0x56a   :  { %453 = vsyncpa [#allocation4], 1 }

</bundles_post_ra>
